<compile_context>
chip_gen: v6e
topology: v6e:2x2x1
jax: 0.10.0
libtpu: 0.0.40
codegen_flags: <defaults>
</compile_context>

<pallas_src>
import functools

import jax
import jax.numpy as jnp
from jax import lax
from jax.experimental import pallas as pl
from jax.experimental.pallas import tpu as pltpu


def _round_up(v, m):
    return (v + m - 1) // m * m


def _vmem_limit(*nbytes):
    """Scoped-VMEM budget: 2x the computed working set, floored at 16 MiB and
    capped at 64 MiB so the same value is valid on v7x (64 MiB physical)."""
    need = int(sum(nbytes))
    return int(min(max(2 * need, 16 * 1024 * 1024), 64 * 1024 * 1024))


# ----------------------------------------------------------------------------
# O = A @ B with the (small) RHS fully resident in VMEM.
# Grid = (row tiles of A, K tiles); K is the last axis so the (tm, N) f32
# accumulator persists across the reduction.  The RHS BlockSpec covers the
# whole array with a constant index_map -> DMA'd exactly once per call.
# ----------------------------------------------------------------------------
def _mm_resident_rhs_kernel(a_ref, b_ref, o_ref, acc_ref, *, tk):
    k = pl.program_id(1)

    @pl.when(k == 0)
    def _():
        acc_ref[...] = jnp.zeros_like(acc_ref)

    off = pl.multiple_of(k * tk, tk)
    acc_ref[...] += jnp.dot(a_ref[...], b_ref[pl.ds(off, tk), :],
                            preferred_element_type=jnp.float32)

    @pl.when(k == pl.num_programs(1) - 1)
    def _():
        o_ref[...] = acc_ref[...].astype(o_ref.dtype)


def _matmul_resident_rhs(a, b, *, tm, tk, out_dtype):
    m, kdim = a.shape
    _, n = b.shape
    a_item = jnp.dtype(a.dtype).itemsize
    b_item = jnp.dtype(b.dtype).itemsize
    o_item = jnp.dtype(out_dtype).itemsize
    return pl.pallas_call(
        functools.partial(_mm_resident_rhs_kernel, tk=tk),
        out_shape=jax.ShapeDtypeStruct((m, n), out_dtype),
        grid=(m // tm, kdim // tk),
        in_specs=[
            pl.BlockSpec((tm, tk), lambda i, kk: (i, kk)),   # A tile (streamed)
            pl.BlockSpec((kdim, n), lambda i, kk: (0, 0)),   # B fully resident
        ],
        out_specs=pl.BlockSpec((tm, n), lambda i, kk: (i, 0)),
        scratch_shapes=[pltpu.VMEM((tm, n), jnp.float32)],
        compiler_params=pltpu.CompilerParams(
            dimension_semantics=("parallel", "arbitrary"),
            vmem_limit_bytes=_vmem_limit(
                2 * tm * tk * a_item,     # double-buffered A tiles
                2 * kdim * n * b_item,    # resident B (x2 safety)
                2 * tm * n * o_item,      # output block
                tm * n * 4)),             # f32 accumulator
        cost_estimate=pl.CostEstimate(
            flops=2 * m * n * kdim, transcendentals=0,
            bytes_accessed=m * kdim * a_item + kdim * n * b_item
            + m * n * o_item),
    )(a, b)


# ----------------------------------------------------------------------------
# Fused final step: out = log_softmax(adj @ z + bias) over the real classes.
# Same resident-z structure as above, with the epilogue on the last K step.
# ----------------------------------------------------------------------------
def _final_kernel(adj_ref, z_ref, b_ref, out_ref, acc_ref, *, nclass, tk):
    k = pl.program_id(1)

    @pl.when(k == 0)
    def _():
        acc_ref[...] = jnp.zeros_like(acc_ref)

    off = pl.multiple_of(k * tk, tk)
    acc_ref[...] += jnp.dot(adj_ref[...], z_ref[pl.ds(off, tk), :],
                            preferred_element_type=jnp.float32)

    @pl.when(k == pl.num_programs(1) - 1)
    def _():
        logits = acc_ref[...] + b_ref[...]
        # Mask lane-padding columns so they don't perturb the row reductions.
        col = lax.broadcasted_iota(jnp.int32, logits.shape, 1)
        logits = jnp.where(col < nclass, logits, -1e30)
        m = jnp.max(logits, axis=1, keepdims=True)
        zc = logits - m
        lse = jnp.log(jnp.sum(jnp.exp(zc), axis=1, keepdims=True))
        out_ref[...] = (zc - lse).astype(out_ref.dtype)


@functools.partial(jax.jit, static_argnames=("order", "row_tile"))
def sgc_forward(x, adj, w, b, *, order, row_tile=512):
    """x: (N, F), adj: (N, N), w: (C, F) Linear weight, b: (C,) bias.
    Returns (N, C) log-probabilities with the same semantics as the module."""
    n, f = x.shape
    c = w.shape[0]
    # PyTorch: `range(order - 1)` extra mm's on adj plus one `A_p @ x`
    # => the adjacency is applied max(order, 1) times in total.
    num_prop = max(int(order), 1)

    # Tiling: big row/K tiles (512 by default), clipped for small graphs so we
    # don't over-pad; every tile dim stays a multiple of (8, 128).
    tm = min(row_tile, _round_up(n, 128))        # adj row & K tile
    n_p = _round_up(n, tm)                       # padded node count
    f_p = _round_up(f, 128) if f <= 512 else _round_up(f, 512)
    tk_proj = min(512, f_p)                      # projection K tile
    c_p = _round_up(c, 128)                      # lane-dense class dim

    f32, bf16 = jnp.float32, jnp.bfloat16
    # adj and the propagated z intermediates are bf16 (halves the dominant HBM
    # stream); projection inputs and the softmax epilogue stay in f32.
    x_p = jnp.zeros((n_p, f_p), f32).at[:n, :f].set(x.astype(f32))
    wt_p = jnp.zeros((f_p, c_p), f32).at[:f, :c].set(w.T.astype(f32))
    adj_p = jnp.zeros((n_p, n_p), bf16).at[:n, :n].set(adj.astype(bf16))
    b_p = jnp.zeros((1, c_p), f32).at[0, :c].set(b.astype(f32))

    # Project first (C <= F): z0 = x @ W^T, shape (Np, Cp), bf16 output.
    z = _matmul_resident_rhs(x_p, wt_p, tm=tm, tk=tk_proj, out_dtype=bf16)

    # Intermediate propagations: z <- adj @ z   (num_prop - 1 times).
    # z is resident in VMEM inside each call; adj is the only streamed operand.
    for _ in range(num_prop - 1):
        z = _matmul_resident_rhs(adj_p, z, tm=tm, tk=tm, out_dtype=bf16)

    # Final propagation fused with bias add + row-wise log_softmax (f32 out).
    kernel = functools.partial(_final_kernel, nclass=c, tk=tm)
    out_p = pl.pallas_call(
        kernel,
        out_shape=jax.ShapeDtypeStruct((n_p, c_p), jnp.float32),
        grid=(n_p // tm, n_p // tm),
        in_specs=[
            pl.BlockSpec((tm, tm), lambda i, k: (i, k)),     # adj tile (streamed)
            pl.BlockSpec((n_p, c_p), lambda i, k: (0, 0)),   # z fully resident
            pl.BlockSpec((1, c_p), lambda i, k: (0, 0)),     # bias resident
        ],
        out_specs=pl.BlockSpec((tm, c_p), lambda i, k: (i, 0)),
        scratch_shapes=[pltpu.VMEM((tm, c_p), jnp.float32)],
        compiler_params=pltpu.CompilerParams(
            dimension_semantics=("parallel", "arbitrary"),
            vmem_limit_bytes=_vmem_limit(
                2 * tm * tm * 2,          # double-buffered adj tiles (bf16)
                2 * n_p * c_p * 2,        # resident z (bf16, x2 safety)
                2 * tm * c_p * 4,         # f32 output block
                tm * c_p * 4,             # f32 accumulator
                c_p * 4)),                # bias
        cost_estimate=pl.CostEstimate(
            flops=2 * n_p * n_p * c_p + 5 * n_p * c_p,
            transcendentals=2 * n_p * c_p,
            bytes_accessed=2 * n_p * n_p + 2 * n_p * c_p + 4 * n_p * c_p),
    )(adj_p, z, b_p)

    # Strip row / class padding.
    return out_p[:n, :c]


def _reference(x, adj, w, b, *, order):
    # Mirrors the PyTorch module exactly (powers adj, then propagates), in f32.
    a_pow = adj
    for _ in range(order - 1):
        a_pow = a_pow @ adj
    h = a_pow @ x
    logits = h @ w.T + b
    return jax.nn.log_softmax(logits, axis=1)


if __name__ == "__main__":
    # Small, deterministic problem: N=16 nodes, nfeat=32, nclass=8, order=3.
    N, NFEAT, NCLASS, ORDER = 16, 32, 8, 3

    key = jax.random.PRNGKey(0)
    kx, ka, kw, kb = jax.random.split(key, 4)

    x = jax.random.normal(kx, (N, NFEAT), dtype=jnp.float32)

    # Symmetric row-normalized-ish adjacency (dense), deterministic.
    a_raw = jax.random.uniform(ka, (N, N), dtype=jnp.float32)
    adj = (a_raw + a_raw.T) * 0.5
    adj = adj / jnp.sum(adj, axis=1, keepdims=True)

    # nn.Linear(nfeat, nclass): weight (nclass, nfeat), bias (nclass,)
    bound = 1.0 / jnp.sqrt(jnp.float32(NFEAT))
    w = jax.random.uniform(kw, (NCLASS, NFEAT), dtype=jnp.float32,
                           minval=-bound, maxval=bound)
    b = jax.random.uniform(kb, (NCLASS,), dtype=jnp.float32,
                           minval=-bound, maxval=bound)

    out = sgc_forward(x, adj, w, b, order=ORDER)
    out = jax.block_until_ready(out)

    ref = _reference(x, adj, w, b, order=ORDER)
    assert out.shape == (N, NCLASS)
    # Tolerance accounts for bf16 adj/z storage (f32 MXU accumulation);
    # observed error is ~1e-2 on log-probabilities at order=3.
    assert jnp.allclose(out, ref, atol=5e-2, rtol=5e-2), "mismatch vs reference"

    print("KERNEL_OK")
</pallas_src>

<mosaic_0001>
module attributes {stable_mosaic.version = 11 : i64} {
  func.func @_mm_resident_rhs_kernel(%arg0: i32, %arg1: i32, %arg2: memref<128x128xf32, #tpu.memory_space<vmem>>, %arg3: memref<128x128xf32, #tpu.memory_space<vmem>>, %arg4: memref<128x128xbf16, #tpu.memory_space<vmem>>, %arg5: memref<128x128xf32, #tpu.memory_space<vmem>>) attributes {dimension_semantics = [#tpu.dimension_semantics<parallel>, #tpu.dimension_semantics<arbitrary>], iteration_bounds = array<i64: 1, 1>, scalar_prefetch = 0 : i64, scratch_operands = 1 : i64, tpu.core_type = #tpu.core_type<tc>, window_params = [{transform_indices = @transform_0, window_bounds = array<i64: 128, 128>}, {pipeline_mode = #tpu.pipeline_mode<synchronous>, transform_indices = @transform_1, window_bounds = array<i64: 128, 128>}, {transform_indices = @transform_2, window_bounds = array<i64: 128, 128>}]} {
    %c0_i32 = arith.constant 0 : i32
    %0 = arith.cmpi eq, %arg1, %c0_i32 : i32
    %1 = arith.extui %0 : i1 to i32
    %c0_i32_0 = arith.constant 0 : i32
    %2 = arith.cmpi ne, %1, %c0_i32_0 : i32
    scf.if %2 {
      %cst_9 = arith.constant 0.000000e+00 : f32
      %15 = vector.broadcast %cst_9 : f32 to vector<128x128xf32>
      %c0_10 = arith.constant 0 : index
      %c0_11 = arith.constant 0 : index
      %16 = vector.load %arg5[%c0_10, %c0_11] : memref<128x128xf32, #tpu.memory_space<vmem>>, vector<128x128xf32>
      tpu.vector_store %arg5[%c0_10, %c0_11], %15 {strides = array<i32>} : memref<128x128xf32, #tpu.memory_space<vmem>>, vector<128x128xf32>,
    } else {
    }
    %c128_i32 = arith.constant 128 : i32
    %3 = arith.muli %arg1, %c128_i32 : i32
    %4 = tpu.assume_multiple %3, 128 : i32
    %c0 = arith.constant 0 : index
    %c0_1 = arith.constant 0 : index
    %5 = vector.load %arg5[%c0, %c0_1] : memref<128x128xf32, #tpu.memory_space<vmem>>, vector<128x128xf32>
    %c0_2 = arith.constant 0 : index
    %c0_3 = arith.constant 0 : index
    %6 = vector.load %arg2[%c0_2, %c0_3] : memref<128x128xf32, #tpu.memory_space<vmem>>, vector<128x128xf32>
    %7 = arith.index_cast %4 : i32 to index
    %c0_4 = arith.constant 0 : index
    %8 = vector.load %arg3[%7, %c0_4] : memref<128x128xf32, #tpu.memory_space<vmem>>, vector<128x128xf32>
    %cst = arith.constant dense<0.000000e+00> : vector<128x128xf32>
    %9 = tpu.matmul %6, %8, %cst {dimension_numbers = #tpu.dot_dimension_numbers<[1], [0], [0], [1], [0, 0, 1, 1], [], []>} : vector<128x128xf32>, vector<128x128xf32>, vector<128x128xf32> -> vector<128x128xf32>
    %10 = arith.addf %5, %9 : vector<128x128xf32>
    %c0_5 = arith.constant 0 : index
    %c0_6 = arith.constant 0 : index
    %11 = vector.load %arg5[%c0_5, %c0_6] : memref<128x128xf32, #tpu.memory_space<vmem>>, vector<128x128xf32>
    tpu.vector_store %arg5[%c0_5, %c0_6], %10 {strides = array<i32>} : memref<128x128xf32, #tpu.memory_space<vmem>>, vector<128x128xf32>,
    %c0_i32_7 = arith.constant 0 : i32
    %12 = arith.cmpi eq, %arg1, %c0_i32_7 : i32
    %13 = arith.extui %12 : i1 to i32
    %c0_i32_8 = arith.constant 0 : i32
    %14 = arith.cmpi ne, %13, %c0_i32_8 : i32
    scf.if %14 {
      %c0_9 = arith.constant 0 : index
      %c0_10 = arith.constant 0 : index
      %15 = vector.load %arg5[%c0_9, %c0_10] : memref<128x128xf32, #tpu.memory_space<vmem>>, vector<128x128xf32>
      %16 = arith.truncf %15 : vector<128x128xf32> to vector<128x128xbf16>
      %c0_11 = arith.constant 0 : index
      %c0_12 = arith.constant 0 : index
      %17 = vector.load %arg4[%c0_11, %c0_12] : memref<128x128xbf16, #tpu.memory_space<vmem>>, vector<128x128xbf16>
      tpu.vector_store %arg4[%c0_11, %c0_12], %16 {strides = array<i32>} : memref<128x128xbf16, #tpu.memory_space<vmem>>, vector<128x128xbf16>,
    } else {
    }
    return
  }
  func.func @transform_0(%arg0: i32, %arg1: i32) -> (i32, i32) {
    %c0_i32 = arith.constant 0 : i32
    return %arg0, %arg1 : i32, i32
  }
  func.func @transform_1(%arg0: i32, %arg1: i32) -> (i32, i32) {
    %c0_i32 = arith.constant 0 : i32
    %c0_i32_0 = arith.constant 0 : i32
    %c0_i32_1 = arith.constant 0 : i32
    return %c0_i32, %c0_i32_0 : i32, i32
  }
  func.func @transform_2(%arg0: i32, %arg1: i32) -> (i32, i32) {
    %c0_i32 = arith.constant 0 : i32
    %c0_i32_0 = arith.constant 0 : i32
    return %arg0, %c0_i32 : i32, i32
  }
}

module attributes {stable_mosaic.version = 11 : i64} {
  func.func @_mm_resident_rhs_kernel(%arg0: i32, %arg1: i32, %arg2: memref<128x128xbf16, #tpu.memory_space<vmem>>, %arg3: memref<128x128xbf16, #tpu.memory_space<vmem>>, %arg4: memref<128x128xbf16, #tpu.memory_space<vmem>>, %arg5: memref<128x128xf32, #tpu.memory_space<vmem>>) attributes {dimension_semantics = [#tpu.dimension_semantics<parallel>, #tpu.dimension_semantics<arbitrary>], iteration_bounds = array<i64: 1, 1>, scalar_prefetch = 0 : i64, scratch_operands = 1 : i64, tpu.core_type = #tpu.core_type<tc>, window_params = [{transform_indices = @transform_0, window_bounds = array<i64: 128, 128>}, {pipeline_mode = #tpu.pipeline_mode<synchronous>, transform_indices = @transform_1, window_bounds = array<i64: 128, 128>}, {transform_indices = @transform_2, window_bounds = array<i64: 128, 128>}]} {
    %c0_i32 = arith.constant 0 : i32
    %0 = arith.cmpi eq, %arg1, %c0_i32 : i32
    %1 = arith.extui %0 : i1 to i32
    %c0_i32_0 = arith.constant 0 : i32
    %2 = arith.cmpi ne, %1, %c0_i32_0 : i32
    scf.if %2 {
      %cst_9 = arith.constant 0.000000e+00 : f32
      %15 = vector.broadcast %cst_9 : f32 to vector<128x128xf32>
      %c0_10 = arith.constant 0 : index
      %c0_11 = arith.constant 0 : index
      %16 = vector.load %arg5[%c0_10, %c0_11] : memref<128x128xf32, #tpu.memory_space<vmem>>, vector<128x128xf32>
      tpu.vector_store %arg5[%c0_10, %c0_11], %15 {strides = array<i32>} : memref<128x128xf32, #tpu.memory_space<vmem>>, vector<128x128xf32>,
    } else {
    }
    %c128_i32 = arith.constant 128 : i32
    %3 = arith.muli %arg1, %c128_i32 : i32
    %4 = tpu.assume_multiple %3, 128 : i32
    %c0 = arith.constant 0 : index
    %c0_1 = arith.constant 0 : index
    %5 = vector.load %arg5[%c0, %c0_1] : memref<128x128xf32, #tpu.memory_space<vmem>>, vector<128x128xf32>
    %c0_2 = arith.constant 0 : index
    %c0_3 = arith.constant 0 : index
    %6 = vector.load %arg2[%c0_2, %c0_3] : memref<128x128xbf16, #tpu.memory_space<vmem>>, vector<128x128xbf16>
    %7 = arith.index_cast %4 : i32 to index
    %c0_4 = arith.constant 0 : index
    %8 = vector.load %arg3[%7, %c0_4] : memref<128x128xbf16, #tpu.memory_space<vmem>>, vector<128x128xbf16>
    %cst = arith.constant dense<0.000000e+00> : vector<128x128xf32>
    %9 = tpu.matmul %6, %8, %cst {dimension_numbers = #tpu.dot_dimension_numbers<[1], [0], [0], [1], [0, 0, 1, 1], [], []>} : vector<128x128xbf16>, vector<128x128xbf16>, vector<128x128xf32> -> vector<128x128xf32>
    %10 = arith.addf %5, %9 : vector<128x128xf32>
    %c0_5 = arith.constant 0 : index
    %c0_6 = arith.constant 0 : index
    %11 = vector.load %arg5[%c0_5, %c0_6] : memref<128x128xf32, #tpu.memory_space<vmem>>, vector<128x128xf32>
    tpu.vector_store %arg5[%c0_5, %c0_6], %10 {strides = array<i32>} : memref<128x128xf32, #tpu.memory_space<vmem>>, vector<128x128xf32>,
    %c0_i32_7 = arith.constant 0 : i32
    %12 = arith.cmpi eq, %arg1, %c0_i32_7 : i32
    %13 = arith.extui %12 : i1 to i32
    %c0_i32_8 = arith.constant 0 : i32
    %14 = arith.cmpi ne, %13, %c0_i32_8 : i32
    scf.if %14 {
      %c0_9 = arith.constant 0 : index
      %c0_10 = arith.constant 0 : index
      %15 = vector.load %arg5[%c0_9, %c0_10] : memref<128x128xf32, #tpu.memory_space<vmem>>, vector<128x128xf32>
      %16 = arith.truncf %15 : vector<128x128xf32> to vector<128x128xbf16>
      %c0_11 = arith.constant 0 : index
      %c0_12 = arith.constant 0 : index
      %17 = vector.load %arg4[%c0_11, %c0_12] : memref<128x128xbf16, #tpu.memory_space<vmem>>, vector<128x128xbf16>
      tpu.vector_store %arg4[%c0_11, %c0_12], %16 {strides = array<i32>} : memref<128x128xbf16, #tpu.memory_space<vmem>>, vector<128x128xbf16>,
    } else {
    }
    return
  }
  func.func @transform_0(%arg0: i32, %arg1: i32) -> (i32, i32) {
    %c0_i32 = arith.constant 0 : i32
    return %arg0, %arg1 : i32, i32
  }
  func.func @transform_1(%arg0: i32, %arg1: i32) -> (i32, i32) {
    %c0_i32 = arith.constant 0 : i32
    %c0_i32_0 = arith.constant 0 : i32
    %c0_i32_1 = arith.constant 0 : i32
    return %c0_i32, %c0_i32_0 : i32, i32
  }
  func.func @transform_2(%arg0: i32, %arg1: i32) -> (i32, i32) {
    %c0_i32 = arith.constant 0 : i32
    %c0_i32_0 = arith.constant 0 : i32
    return %arg0, %c0_i32 : i32, i32
  }
}

module attributes {stable_mosaic.version = 11 : i64} {
  func.func @_final_kernel(%arg0: i32, %arg1: i32, %arg2: memref<128x128xbf16, #tpu.memory_space<vmem>>, %arg3: memref<128x128xbf16, #tpu.memory_space<vmem>>, %arg4: memref<1x128xf32, #tpu.memory_space<vmem>>, %arg5: memref<128x128xf32, #tpu.memory_space<vmem>>, %arg6: memref<128x128xf32, #tpu.memory_space<vmem>>) attributes {dimension_semantics = [#tpu.dimension_semantics<parallel>, #tpu.dimension_semantics<arbitrary>], iteration_bounds = array<i64: 1, 1>, scalar_prefetch = 0 : i64, scratch_operands = 1 : i64, tpu.core_type = #tpu.core_type<tc>, window_params = [{transform_indices = @transform_0, window_bounds = array<i64: 128, 128>}, {pipeline_mode = #tpu.pipeline_mode<synchronous>, transform_indices = @transform_1, window_bounds = array<i64: 128, 128>}, {pipeline_mode = #tpu.pipeline_mode<synchronous>, transform_indices = @transform_2, window_bounds = array<i64: 1, 128>}, {transform_indices = @transform_3, window_bounds = array<i64: 128, 128>}]} {
    %c0_i32 = arith.constant 0 : i32
    %0 = arith.cmpi eq, %arg1, %c0_i32 : i32
    %1 = arith.extui %0 : i1 to i32
    %c0_i32_0 = arith.constant 0 : i32
    %2 = arith.cmpi ne, %1, %c0_i32_0 : i32
    scf.if %2 {
      %cst_9 = arith.constant 0.000000e+00 : f32
      %15 = vector.broadcast %cst_9 : f32 to vector<128x128xf32>
      %c0_10 = arith.constant 0 : index
      %c0_11 = arith.constant 0 : index
      %16 = vector.load %arg6[%c0_10, %c0_11] : memref<128x128xf32, #tpu.memory_space<vmem>>, vector<128x128xf32>
      tpu.vector_store %arg6[%c0_10, %c0_11], %15 {strides = array<i32>} : memref<128x128xf32, #tpu.memory_space<vmem>>, vector<128x128xf32>,
    } else {
    }
    %c128_i32 = arith.constant 128 : i32
    %3 = arith.muli %arg1, %c128_i32 : i32
    %4 = tpu.assume_multiple %3, 128 : i32
    %c0 = arith.constant 0 : index
    %c0_1 = arith.constant 0 : index
    %5 = vector.load %arg6[%c0, %c0_1] : memref<128x128xf32, #tpu.memory_space<vmem>>, vector<128x128xf32>
    %c0_2 = arith.constant 0 : index
    %c0_3 = arith.constant 0 : index
    %6 = vector.load %arg2[%c0_2, %c0_3] : memref<128x128xbf16, #tpu.memory_space<vmem>>, vector<128x128xbf16>
    %7 = arith.index_cast %4 : i32 to index
    %c0_4 = arith.constant 0 : index
    %8 = vector.load %arg3[%7, %c0_4] : memref<128x128xbf16, #tpu.memory_space<vmem>>, vector<128x128xbf16>
    %cst = arith.constant dense<0.000000e+00> : vector<128x128xf32>
    %9 = tpu.matmul %6, %8, %cst {dimension_numbers = #tpu.dot_dimension_numbers<[1], [0], [0], [1], [0, 0, 1, 1], [], []>} : vector<128x128xbf16>, vector<128x128xbf16>, vector<128x128xf32> -> vector<128x128xf32>
    %10 = arith.addf %5, %9 : vector<128x128xf32>
    %c0_5 = arith.constant 0 : index
    %c0_6 = arith.constant 0 : index
    %11 = vector.load %arg6[%c0_5, %c0_6] : memref<128x128xf32, #tpu.memory_space<vmem>>, vector<128x128xf32>
    tpu.vector_store %arg6[%c0_5, %c0_6], %10 {strides = array<i32>} : memref<128x128xf32, #tpu.memory_space<vmem>>, vector<128x128xf32>,
    %c0_i32_7 = arith.constant 0 : i32
    %12 = arith.cmpi eq, %arg1, %c0_i32_7 : i32
    %13 = arith.extui %12 : i1 to i32
    %c0_i32_8 = arith.constant 0 : i32
    %14 = arith.cmpi ne, %13, %c0_i32_8 : i32
    scf.if %14 {
      %c0_9 = arith.constant 0 : index
      %c0_10 = arith.constant 0 : index
      %15 = vector.load %arg6[%c0_9, %c0_10] : memref<128x128xf32, #tpu.memory_space<vmem>>, vector<128x128xf32>
      %c0_11 = arith.constant 0 : index
      %c0_12 = arith.constant 0 : index
      %16 = vector.load %arg4[%c0_11, %c0_12] : memref<1x128xf32, #tpu.memory_space<vmem>>, vector<1x128xf32>
      %17 = vector.broadcast %16 : vector<1x128xf32> to vector<128x128xf32>
      %18 = arith.addf %15, %17 : vector<128x128xf32>
      %19 = tpu.iota {dimensions = array<i32: 1>} : vector<128x128xi32>
      %c8_i32 = arith.constant 8 : i32
      %20 = vector.broadcast %c8_i32 : i32 to vector<128x128xi32>
      %21 = arith.cmpi slt, %19, %20 : vector<128x128xi32>
      %cst_13 = arith.constant -1.000000e+30 : f32
      %22 = vector.broadcast %cst_13 : f32 to vector<128x128xf32>
      %23 = arith.select %21, %18, %22 : vector<128x128xi1>, vector<128x128xf32>
      %cst_14 = arith.constant dense<0xFF800000> : vector<128xf32>
      %24 = vector.multi_reduction <maximumf>, %23, %cst_14 [1] : vector<128x128xf32> to vector<128xf32>
      %25 = vector.shape_cast %24 : vector<128xf32> to vector<128x1xf32>
      %26 = vector.broadcast %25 : vector<128x1xf32> to vector<128x128xf32>
      %27 = arith.subf %23, %26 : vector<128x128xf32>
      %28 = math.exp %27 : vector<128x128xf32>
      %cst_15 = arith.constant dense<0.000000e+00> : vector<128xf32>
      %29 = vector.multi_reduction <add>, %28, %cst_15 [1] : vector<128x128xf32> to vector<128xf32>
      %30 = vector.shape_cast %29 : vector<128xf32> to vector<128x1xf32>
      %31 = math.log %30 : vector<128x1xf32>
      %32 = vector.broadcast %31 : vector<128x1xf32> to vector<128x128xf32>
      %33 = arith.subf %27, %32 : vector<128x128xf32>
      %c0_16 = arith.constant 0 : index
      %c0_17 = arith.constant 0 : index
      %34 = vector.load %arg5[%c0_16, %c0_17] : memref<128x128xf32, #tpu.memory_space<vmem>>, vector<128x128xf32>
      tpu.vector_store %arg5[%c0_16, %c0_17], %33 {strides = array<i32>} : memref<128x128xf32, #tpu.memory_space<vmem>>, vector<128x128xf32>,
    } else {
    }
    return
  }
  func.func @transform_0(%arg0: i32, %arg1: i32) -> (i32, i32) {
    %c0_i32 = arith.constant 0 : i32
    return %arg0, %arg1 : i32, i32
  }
  func.func @transform_1(%arg0: i32, %arg1: i32) -> (i32, i32) {
    %c0_i32 = arith.constant 0 : i32
    %c0_i32_0 = arith.constant 0 : i32
    %c0_i32_1 = arith.constant 0 : i32
    return %c0_i32, %c0_i32_0 : i32, i32
  }
  func.func @transform_2(%arg0: i32, %arg1: i32) -> (i32, i32) {
    %c0_i32 = arith.constant 0 : i32
    %c0_i32_0 = arith.constant 0 : i32
    %c0_i32_1 = arith.constant 0 : i32
    return %c0_i32, %c0_i32_0 : i32, i32
  }
  func.func @transform_3(%arg0: i32, %arg1: i32) -> (i32, i32) {
    %c0_i32 = arith.constant 0 : i32
    %c0_i32_0 = arith.constant 0 : i32
    return %arg0, %c0_i32 : i32, i32
  }
}

</mosaic_0001>

<bundles_post_ra>
// kernel: sgc_forward.4
= control target key start
LH: loop header
LB: loop body
LE: loop exit
PB: predicated region body
PF: predicated region fallthrough
CT: control target
= control target key end

     0   :  { %s695_s1 = inlined_call_operand.vmem [shape: f32[128,128], index: 1, kind: input, shape index: {}]   ;;  %s696_s0 = inlined_call_operand.vmem [shape: f32[128,128], index: 0, kind: input, shape index: {}]   ;;  %s697_s2 = inlined_call_operand.vmem [shape: bf16[128,128], index: 2, kind: output, shape index: {}]  }
   0x1   :  { %v80_v0 = vld [vmem:[%s695_s1 + $0x78] sm:$0xff]  ;;  %v79_v1 = vld [vmem:[%s695_s1 + $0x70] sm:$0xff]  ;;  %v78_v2 = vld [vmem:[%s695_s1 + $0x68] sm:$0xff] }
   0x2   :  { %472 = vmatprep.subr.mxu0 %v80_v0  ;;  %528 = vmatprep.subr.mxu1 %v80_v0  ;;  %v77_v3 = vld [vmem:[%s695_s1 + $0x60] sm:$0xff]  ;;  %v76_v4 = vld [vmem:[%s695_s1 + $0x58] sm:$0xff]  ;;  %v75_v5 = vld [vmem:[%s695_s1 + $0x50] sm:$0xff] }
   0x3   :  { %473 = vmatpush3.msra.mxu0 %v80_v0  ;;  %544 = vmatpush3.msra.mxu1 %v80_v0  ;;  %v74_v6 = vld [vmem:[%s695_s1 + $0x48] sm:$0xff]  ;;  %v73_v7 = vld [vmem:[%s695_s1 + $0x40] sm:$0xff]  ;;  %v72_v8 = vld [vmem:[%s695_s1 + $0x38] sm:$0xff] }
   0x4   :  { %474 = vmatprep.subr.mxu0 %v79_v1  ;;  %529 = vmatprep.subr.mxu1 %v79_v1  ;;  %v71_v9 = vld [vmem:[%s695_s1 + $0x30] sm:$0xff]  ;;  %v70_v10 = vld [vmem:[%s695_s1 + $0x28] sm:$0xff]  ;;  %v69_v11 = vld [vmem:[%s695_s1 + $0x20] sm:$0xff] }
   0x5   :  { %475 = vmatpush3.msra.mxu0 %v79_v1  ;;  %545 = vmatpush3.msra.mxu1 %v79_v1  ;;  %v68_v12 = vld [vmem:[%s695_s1 + $0x18] sm:$0xff]  ;;  %v67_v13 = vld [vmem:[%s695_s1 + $0x10] sm:$0xff]  ;;  %v66_v14 = vld [vmem:[%s695_s1 + $0x8] sm:$0xff] }
   0x6   :  { %476 = vmatprep.subr.mxu0 %v78_v2  ;;  %530 = vmatprep.subr.mxu1 %v78_v2  ;;  %v65_v15 = vld [vmem:[%s695_s1] sm:$0xff]  ;;  %v49_v18 = vld [vmem:[%s696_s0 + $0x8] sm:$0xff]  ;;  %v50_v20 = vld [vmem:[%s696_s0 + $0x10] sm:$0xff] }
   0x7   :  { %477 = vmatpush3.msra.mxu0 %v78_v2  ;;  %546 = vmatpush3.msra.mxu1 %v78_v2  ;;  %v48_v16 = vld [vmem:[%s696_s0] sm:$0xff]  ;;  %v57_v19 = vld [vmem:[%s696_s0 + $0x48] sm:$0xff]  ;;  %v58_v21 = vld [vmem:[%s696_s0 + $0x50] sm:$0xff] }
   0x8   :  { %478 = vmatprep.subr.mxu0 %v77_v3  ;;  %531 = vmatprep.subr.mxu1 %v77_v3  ;;  %v56_v17 = vld [vmem:[%s696_s0 + $0x40] sm:$0xff]  ;;  %v51_v22 = vld [vmem:[%s696_s0 + $0x18] sm:$0xff]  ;;  %v53_v26 = vld [vmem:[%s696_s0 + $0x28] sm:$0xff] }
   0x9   :  { %479 = vmatpush3.msra.mxu0 %v77_v3  ;;  %547 = vmatpush3.msra.mxu1 %v77_v3  ;;  %v59_v23 = vld [vmem:[%s696_s0 + $0x58] sm:$0xff]  ;;  %v52_v24 = vld [vmem:[%s696_s0 + $0x20] sm:$0xff]  ;;  %v61_v27 = vld [vmem:[%s696_s0 + $0x68] sm:$0xff] }
   0xa   :  { %480 = vmatprep.subr.mxu0 %v76_v4  ;;  %532 = vmatprep.subr.mxu1 %v76_v4  ;;  %v60_v25 = vld [vmem:[%s696_s0 + $0x60] sm:$0xff]  ;;  %v54_v28 = vld [vmem:[%s696_s0 + $0x30] sm:$0xff]  ;;  %v55_v30 = vld [vmem:[%s696_s0 + $0x38] sm:$0xff] }
   0xb   :  { %481 = vmatpush3.msra.mxu0 %v76_v4  ;;  %548 = vmatpush3.msra.mxu1 %v76_v4  ;;  %v62_v29 = vld [vmem:[%s696_s0 + $0x70] sm:$0xff]  ;;  %v63_v31 = vld [vmem:[%s696_s0 + $0x78] sm:$0xff] }
   0xc   :  { %482 = vmatprep.subr.mxu0 %v75_v5  ;;  %533 = vmatprep.subr.mxu1 %v75_v5 }
   0xd   :  { %483 = vmatpush3.msra.mxu0 %v75_v5  ;;  %549 = vmatpush3.msra.mxu1 %v75_v5 }
   0xe   :  { %484 = vmatprep.subr.mxu0 %v74_v6  ;;  %534 = vmatprep.subr.mxu1 %v74_v6 }
   0xf   :  { %485 = vmatpush3.msra.mxu0 %v74_v6  ;;  %550 = vmatpush3.msra.mxu1 %v74_v6 }
  0x10   :  { %486 = vmatprep.subr.mxu0 %v73_v7  ;;  %535 = vmatprep.subr.mxu1 %v73_v7 }
  0x11   :  { %487 = vmatpush3.msra.mxu0 %v73_v7  ;;  %551 = vmatpush3.msra.mxu1 %v73_v7 }
  0x12   :  { %488 = vmatprep.subr.mxu0 %v72_v8  ;;  %536 = vmatprep.subr.mxu1 %v72_v8 }
  0x13   :  { %489 = vmatpush3.msra.mxu0 %v72_v8  ;;  %552 = vmatpush3.msra.mxu1 %v72_v8 }
  0x14   :  { %490 = vmatprep.subr.mxu0 %v71_v9  ;;  %537 = vmatprep.subr.mxu1 %v71_v9 }
  0x15   :  { %491 = vmatpush3.msra.mxu0 %v71_v9  ;;  %553 = vmatpush3.msra.mxu1 %v71_v9 }
  0x16   :  { %492 = vmatprep.subr.mxu0 %v70_v10  ;;  %538 = vmatprep.subr.mxu1 %v70_v10 }
  0x17   :  { %493 = vmatpush3.msra.mxu0 %v70_v10  ;;  %554 = vmatpush3.msra.mxu1 %v70_v10 }
  0x18   :  { %494 = vmatprep.subr.mxu0 %v69_v11  ;;  %539 = vmatprep.subr.mxu1 %v69_v11 }
  0x19   :  { %495 = vmatpush3.msra.mxu0 %v69_v11  ;;  %555 = vmatpush3.msra.mxu1 %v69_v11 }
  0x1a   :  { %496 = vmatprep.subr.mxu0 %v68_v12  ;;  %540 = vmatprep.subr.mxu1 %v68_v12 }
  0x1b   :  { %497 = vmatpush3.msra.mxu0 %v68_v12  ;;  %556 = vmatpush3.msra.mxu1 %v68_v12 }
  0x1c   :  { %498 = vmatprep.subr.mxu0 %v67_v13  ;;  %541 = vmatprep.subr.mxu1 %v67_v13 }
  0x1d   :  { %499 = vmatpush3.msra.mxu0 %v67_v13  ;;  %557 = vmatpush3.msra.mxu1 %v67_v13 }
  0x1e   :  { %500 = vmatprep.subr.mxu0 %v66_v14  ;;  %542 = vmatprep.subr.mxu1 %v66_v14 }
  0x1f   :  { %501 = vmatpush3.msra.mxu0 %v66_v14  ;;  %558 = vmatpush3.msra.mxu1 %v66_v14 }
  0x20   :  { %502 = vmatprep.subr.mxu0 %v65_v15  ;;  %543 = vmatprep.subr.mxu1 %v65_v15 }
  0x21   :  { %503 = vmatpush3.msra.mxu0 %v65_v15  ;;  %559 = vmatpush3.msra.mxu1 %v65_v15 }
  0x22   :  { %504 = vmatprep.mubr.f32.mxu0 %v48_v16  ;;  %516 = vmatprep.mubr.f32.mxu1 %v56_v17 }
  0x23   :  { %505 = vmatmul.mubr.f32.vlgmr.msra.gmra.mxu0 %v49_v18  ;;  %517 = vmatmul.mubr.f32.vlgmr.msra.gmra.mxu1 %v57_v19 }
  0x24   :  { %507 = vmatprep.mubr.f32.mxu0 %v50_v20  ;;  %519 = vmatprep.mubr.f32.mxu1 %v58_v21 }
  0x27   :  { %508 = vmatmul.mubr.f32.gmra.mxu0 %v51_v22  ;;  %520 = vmatmul.mubr.f32.gmra.mxu1 %v59_v23 }
  0x28   :  { %510 = vmatprep.mubr.f32.mxu0 %v52_v24  ;;  %522 = vmatprep.mubr.f32.mxu1 %v60_v25 }
  0x2b   :  { %511 = vmatmul.mubr.f32.gmra.mxu0 %v53_v26  ;;  %523 = vmatmul.mubr.f32.gmra.mxu1 %v61_v27 }
  0x2c   :  { %513 = vmatprep.mubr.f32.mxu0 %v54_v28  ;;  %525 = vmatprep.mubr.f32.mxu1 %v62_v29 }
  0x2f   :  { %514 = vmatmul.mubr.f32.gmra.mxu0 %v55_v30  ;;  %526 = vmatmul.mubr.f32.gmra.mxu1 %v63_v31 }
  0xe3   :  { %v506_v32 = vpop.f32.mrf.mxu0  ;;  %v518_v33 = vpop.f32.mrf.mxu1 }
  0xe5   :  { %v147_v34 = vpop.f32.mrf.mxu0  ;;  %v187_v35 = vpop.f32.mrf.mxu1 }
  0xe6   :  { %v396_v36 = vpack.c.bf16 %v506_v32, %v147_v34  ;;  %v416_v37 = vpack.c.bf16 %v518_v33, %v187_v35 }
  0xe7   :  { %v509_v38 = vpop.f32.mrf.mxu0  ;;  %v521_v39 = vpop.f32.mrf.mxu1 }
  0xe8   :  { %397 = vst [vmem:[%s697_s2] sm:$0xff] %v396_v36   ;;  %436 = vst [vmem:[%s697_s2 + $0x20] sm:$0xff] %v416_v37  }
  0xe9   :  { %v157_v40 = vpop.f32.mrf.mxu0  ;;  %v197_v41 = vpop.f32.mrf.mxu1 }
  0xea   :  { %v401_v42 = vpack.c.bf16 %v509_v38, %v157_v40  ;;  %v421_v43 = vpack.c.bf16 %v521_v39, %v197_v41 }
  0xeb   :  { %v512_v44 = vpop.f32.mrf.mxu0  ;;  %v524_v45 = vpop.f32.mrf.mxu1 }
  0xec   :  { %433 = vst [vmem:[%s697_s2 + $0x8] sm:$0xff] %v401_v42   ;;  %437 = vst [vmem:[%s697_s2 + $0x28] sm:$0xff] %v421_v43  }
  0xed   :  { %v167_v46 = vpop.f32.mrf.mxu0  ;;  %v207_v47 = vpop.f32.mrf.mxu1 }
  0xee   :  { %v406_v48 = vpack.c.bf16 %v512_v44, %v167_v46  ;;  %v426_v49 = vpack.c.bf16 %v524_v45, %v207_v47 }
  0xef   :  { %v515_v50 = vpop.f32.mrf.mxu0  ;;  %v527_v51 = vpop.f32.mrf.mxu1 }
  0xf0   :  { %434 = vst [vmem:[%s697_s2 + $0x10] sm:$0xff] %v406_v48   ;;  %438 = vst [vmem:[%s697_s2 + $0x30] sm:$0xff] %v426_v49  }
  0xf1   :  { %v177_v52 = vpop.f32.mrf.mxu0  ;;  %v217_v53 = vpop.f32.mrf.mxu1 }
  0xf2   :  { %v411_v54 = vpack.c.bf16 %v515_v50, %v177_v52  ;;  %v431_v55 = vpack.c.bf16 %v527_v51, %v217_v53 }
  0xf4   :  { %435 = vst [vmem:[%s697_s2 + $0x18] sm:$0xff] %v411_v54   ;;  %439 = vst [vmem:[%s697_s2 + $0x38] sm:$0xff] %v431_v55  }

// kernel: sgc_forward.5
= control target key start
LH: loop header
LB: loop body
LE: loop exit
PB: predicated region body
PF: predicated region fallthrough
CT: control target
= control target key end

     0   :  { %s677_s1 = inlined_call_operand.vmem [shape: bf16[128,128], index: 1, kind: input, shape index: {}]   ;;  %s678_s0 = inlined_call_operand.vmem [shape: bf16[128,128], index: 0, kind: input, shape index: {}]   ;;  %s679_s2 = inlined_call_operand.vmem [shape: bf16[128,128], index: 2, kind: output, shape index: {}]  }
   0x1   :  { %v574_v0 = vld [vmem:[%s677_s1 + $0x38] sm:$0xff]   ;;  %v575_v1 = vld [vmem:[%s677_s1 + $0x30] sm:$0xff]   ;;  %v576_v2 = vld [vmem:[%s677_s1 + $0x28] sm:$0xff]  }
   0x2   :  { %526 = vmatprep.subr.bf16.mxu0 %v574_v0  ;;  %558 = vmatprep.subr.bf16.mxu1 %v574_v0  ;;  %v577_v3 = vld [vmem:[%s677_s1 + $0x20] sm:$0xff]   ;;  %v578_v6 = vld [vmem:[%s677_s1 + $0x18] sm:$0xff]   ;;  %v579_v7 = vld [vmem:[%s677_s1 + $0x10] sm:$0xff]  }
   0x3   :  { %527 = vmatpush3.bf16.msra.mxu0 %v574_v0  ;;  %566 = vmatpush3.bf16.msra.mxu1 %v574_v0  ;;  %v582_v4 = vld [vmem:[%s678_s0] sm:$0xff]   ;;  %v580_v8 = vld [vmem:[%s677_s1 + $0x8] sm:$0xff]   ;;  %v586_v12 = vld [vmem:[%s678_s0 + $0x10] sm:$0xff]  }
   0x4   :  { %528 = vmatprep.subr.bf16.mxu0 %v575_v1  ;;  %559 = vmatprep.subr.bf16.mxu1 %v575_v1  ;;  %v583_v5 = vld [vmem:[%s678_s0 + $0x20] sm:$0xff]   ;;  %v584_v10 = vld [vmem:[%s678_s0 + $0x8] sm:$0xff]   ;;  %v587_v13 = vld [vmem:[%s678_s0 + $0x30] sm:$0xff]  }
   0x5   :  { %542 = vmatprep.mubr.bf16.mxu0 %v582_v4  ;;  %550 = vmatprep.mubr.bf16.mxu1 %v583_v5  ;;  %v581_v9 = vld [vmem:[%s677_s1] sm:$0xff]   ;;  %v585_v11 = vld [vmem:[%s678_s0 + $0x28] sm:$0xff]   ;;  %v588_v14 = vld [vmem:[%s678_s0 + $0x18] sm:$0xff]  }
   0x6   :  { %v589_v15 = vld [vmem:[%s678_s0 + $0x38] sm:$0xff]  }
   0x7   :  { %529 = vmatpush3.bf16.msra.mxu0 %v575_v1  ;;  %567 = vmatpush3.bf16.msra.mxu1 %v575_v1 }
   0x8   :  { %530 = vmatprep.subr.bf16.mxu0 %v576_v2  ;;  %560 = vmatprep.subr.bf16.mxu1 %v576_v2 }
   0xb   :  { %531 = vmatpush3.bf16.msra.mxu0 %v576_v2  ;;  %568 = vmatpush3.bf16.msra.mxu1 %v576_v2 }
   0xc   :  { %532 = vmatprep.subr.bf16.mxu0 %v577_v3  ;;  %561 = vmatprep.subr.bf16.mxu1 %v577_v3 }
   0xf   :  { %533 = vmatpush3.bf16.msra.mxu0 %v577_v3  ;;  %569 = vmatpush3.bf16.msra.mxu1 %v577_v3 }
  0x10   :  { %534 = vmatprep.subr.bf16.mxu0 %v578_v6  ;;  %562 = vmatprep.subr.bf16.mxu1 %v578_v6 }
  0x13   :  { %535 = vmatpush3.bf16.msra.mxu0 %v578_v6  ;;  %570 = vmatpush3.bf16.msra.mxu1 %v578_v6 }
  0x14   :  { %536 = vmatprep.subr.bf16.mxu0 %v579_v7  ;;  %563 = vmatprep.subr.bf16.mxu1 %v579_v7 }
  0x17   :  { %537 = vmatpush3.bf16.msra.mxu0 %v579_v7  ;;  %571 = vmatpush3.bf16.msra.mxu1 %v579_v7 }
  0x18   :  { %538 = vmatprep.subr.bf16.mxu0 %v580_v8  ;;  %564 = vmatprep.subr.bf16.mxu1 %v580_v8 }
  0x1b   :  { %539 = vmatpush3.bf16.msra.mxu0 %v580_v8  ;;  %572 = vmatpush3.bf16.msra.mxu1 %v580_v8 }
  0x1c   :  { %540 = vmatprep.subr.bf16.mxu0 %v581_v9  ;;  %565 = vmatprep.subr.bf16.mxu1 %v581_v9 }
  0x1f   :  { %541 = vmatpush3.bf16.msra.mxu0 %v581_v9  ;;  %573 = vmatpush3.bf16.msra.mxu1 %v581_v9 }
  0x22   :  { %543 = vmatmul.mubr.bf16.vlgmr.msra.gmra.mxu0 %v584_v10  ;;  %551 = vmatmul.mubr.bf16.vlgmr.msra.gmra.mxu1 %v585_v11 }
  0x23   :  { %546 = vmatprep.mubr.bf16.mxu0 %v586_v12  ;;  %554 = vmatprep.mubr.bf16.mxu1 %v587_v13 }
  0x2a   :  { %547 = vmatmul.mubr.bf16.gmra.mxu0 %v588_v14  ;;  %555 = vmatmul.mubr.bf16.gmra.mxu1 %v589_v15 }
  0xe2   :  { %v544_v16 = vpop.f32.mrf.mxu0  ;;  %v552_v17 = vpop.f32.mrf.mxu1 }
  0xe4   :  { %v215_v18 = vpop.f32.mrf.mxu0  ;;  %v247_v19 = vpop.f32.mrf.mxu1 }
  0xe6   :  { %v545_v20 = vpop.f32.mrf.mxu0  ;;  %v553_v21 = vpop.f32.mrf.mxu1 }
  0xe7   :  { %v471_v22 = vpack.c.bf16 %v545_v20, %v544_v16  ;;  %v491_v23 = vpack.c.bf16 %v553_v21, %v552_v17 }
  0xe8   :  { %v218_v24 = vpop.f32.mrf.mxu0  ;;  %v250_v25 = vpop.f32.mrf.mxu1 }
  0xe9   :  { %503 = vst [vmem:[%s679_s2 + $0x8] sm:$0xff] %v471_v22   ;;  %507 = vst [vmem:[%s679_s2 + $0x28] sm:$0xff] %v491_v23   ;;  %v466_v26 = vpack.c.bf16 %v218_v24, %v215_v18  ;;  %v486_v27 = vpack.c.bf16 %v250_v25, %v247_v19 }
  0xea   :  { %v548_v28 = vpop.f32.mrf.mxu0  ;;  %v556_v29 = vpop.f32.mrf.mxu1 }
  0xeb   :  { %467 = vst [vmem:[%s679_s2] sm:$0xff] %v466_v26   ;;  %506 = vst [vmem:[%s679_s2 + $0x20] sm:$0xff] %v486_v27  }
  0xec   :  { %v231_v30 = vpop.f32.mrf.mxu0  ;;  %v263_v31 = vpop.f32.mrf.mxu1 }
  0xee   :  { %v549_v32 = vpop.f32.mrf.mxu0  ;;  %v557_v33 = vpop.f32.mrf.mxu1 }
  0xef   :  { %v481_v34 = vpack.c.bf16 %v549_v32, %v548_v28  ;;  %v501_v35 = vpack.c.bf16 %v557_v33, %v556_v29 }
  0xf0   :  { %v234_v36 = vpop.f32.mrf.mxu0  ;;  %v266_v37 = vpop.f32.mrf.mxu1 }
  0xf1   :  { %505 = vst [vmem:[%s679_s2 + $0x18] sm:$0xff] %v481_v34   ;;  %509 = vst [vmem:[%s679_s2 + $0x38] sm:$0xff] %v501_v35   ;;  %v476_v38 = vpack.c.bf16 %v234_v36, %v231_v30  ;;  %v496_v39 = vpack.c.bf16 %v266_v37, %v263_v31 }
  0xf3   :  { %504 = vst [vmem:[%s679_s2 + $0x10] sm:$0xff] %v476_v38   ;;  %508 = vst [vmem:[%s679_s2 + $0x30] sm:$0xff] %v496_v39  }

// kernel: sgc_forward.7
= control target key start
LH: loop header
LB: loop body
LE: loop exit
PB: predicated region body
PF: predicated region fallthrough
CT: control target
= control target key end

     0   :  { %v355_v16 = vlaneseq  ;;  %s947_s1 = inlined_call_operand.vmem [shape: bf16[128,128], index: 1, kind: input, shape index: {}]   ;;  %s948_s0 = inlined_call_operand.vmem [shape: bf16[128,128], index: 0, kind: input, shape index: {}]   ;;  %s949_s2 = inlined_call_operand.vmem [shape: f32[1,128], index: 2, kind: input, shape index: {}]   ;;  %s950_s3 = inlined_call_operand.vmem [shape: f32[128,128], index: 3, kind: output, shape index: {}]  }
   0x1   :  { %v637_v0 = vld [vmem:[%s947_s1 + $0x38] sm:$0xff]   ;;  %v638_v1 = vld [vmem:[%s947_s1 + $0x30] sm:$0xff]   ;;  %v639_v2 = vld [vmem:[%s947_s1 + $0x28] sm:$0xff]  }
   0x2   :  { %589 = vmatprep.subr.bf16.mxu0 %v637_v0  ;;  %621 = vmatprep.subr.bf16.mxu1 %v637_v0  ;;  %v640_v3 = vld [vmem:[%s947_s1 + $0x20] sm:$0xff]   ;;  %v641_v6 = vld [vmem:[%s947_s1 + $0x18] sm:$0xff]   ;;  %v642_v7 = vld [vmem:[%s947_s1 + $0x10] sm:$0xff]   ;;  %v785_v17 = vand.u32 127, %v355_v16 }
   0x3   :  { %590 = vmatpush3.bf16.msra.mxu0 %v637_v0  ;;  %629 = vmatpush3.bf16.msra.mxu1 %v637_v0  ;;  %v645_v4 = vld [vmem:[%s948_s0] sm:$0xff]   ;;  %v643_v8 = vld [vmem:[%s947_s1 + $0x8] sm:$0xff]   ;;  %v649_v12 = vld [vmem:[%s948_s0 + $0x10] sm:$0xff]  }
   0x4   :  { %591 = vmatprep.subr.bf16.mxu0 %v638_v1  ;;  %622 = vmatprep.subr.bf16.mxu1 %v638_v1  ;;  %v646_v5 = vld [vmem:[%s948_s0 + $0x20] sm:$0xff]   ;;  %v647_v10 = vld [vmem:[%s948_s0 + $0x8] sm:$0xff]   ;;  %v651_v13 = vld [vmem:[%s948_s0 + $0x30] sm:$0xff]   ;;  %vm357_vm0 = vcmp.lt.s32.totalorder %v785_v17, 8 }
   0x5   :  { %605 = vmatprep.mubr.bf16.mxu0 %v645_v4  ;;  %613 = vmatprep.mubr.bf16.mxu1 %v646_v5  ;;  %v644_v9 = vld [vmem:[%s947_s1] sm:$0xff]   ;;  %v648_v11 = vld [vmem:[%s948_s0 + $0x28] sm:$0xff]   ;;  %v650_v14 = vld [vmem:[%s948_s0 + $0x18] sm:$0xff]  }
   0x6   :  { %v652_v15 = vld [vmem:[%s948_s0 + $0x38] sm:$0xff]   ;;  %v572_v18 = vld [vmem:[%s949_s2] ss:$0 sm:$0xff] }
   0x7   :  { %592 = vmatpush3.bf16.msra.mxu0 %v638_v1  ;;  %630 = vmatpush3.bf16.msra.mxu1 %v638_v1 }
   0x8   :  { %593 = vmatprep.subr.bf16.mxu0 %v639_v2  ;;  %623 = vmatprep.subr.bf16.mxu1 %v639_v2 }
   0xb   :  { %594 = vmatpush3.bf16.msra.mxu0 %v639_v2  ;;  %631 = vmatpush3.bf16.msra.mxu1 %v639_v2 }
   0xc   :  { %595 = vmatprep.subr.bf16.mxu0 %v640_v3  ;;  %624 = vmatprep.subr.bf16.mxu1 %v640_v3 }
   0xf   :  { %596 = vmatpush3.bf16.msra.mxu0 %v640_v3  ;;  %632 = vmatpush3.bf16.msra.mxu1 %v640_v3 }
  0x10   :  { %597 = vmatprep.subr.bf16.mxu0 %v641_v6  ;;  %625 = vmatprep.subr.bf16.mxu1 %v641_v6 }
  0x13   :  { %598 = vmatpush3.bf16.msra.mxu0 %v641_v6  ;;  %633 = vmatpush3.bf16.msra.mxu1 %v641_v6 }
  0x14   :  { %599 = vmatprep.subr.bf16.mxu0 %v642_v7  ;;  %626 = vmatprep.subr.bf16.mxu1 %v642_v7 }
  0x17   :  { %600 = vmatpush3.bf16.msra.mxu0 %v642_v7  ;;  %634 = vmatpush3.bf16.msra.mxu1 %v642_v7 }
  0x18   :  { %601 = vmatprep.subr.bf16.mxu0 %v643_v8  ;;  %627 = vmatprep.subr.bf16.mxu1 %v643_v8 }
  0x1b   :  { %602 = vmatpush3.bf16.msra.mxu0 %v643_v8  ;;  %635 = vmatpush3.bf16.msra.mxu1 %v643_v8 }
  0x1c   :  { %603 = vmatprep.subr.bf16.mxu0 %v644_v9  ;;  %628 = vmatprep.subr.bf16.mxu1 %v644_v9 }
  0x1f   :  { %604 = vmatpush3.bf16.msra.mxu0 %v644_v9  ;;  %636 = vmatpush3.bf16.msra.mxu1 %v644_v9 }
  0x22   :  { %606 = vmatmul.mubr.bf16.vlgmr.msra.gmra.mxu0 %v647_v10  ;;  %614 = vmatmul.mubr.bf16.vlgmr.msra.gmra.mxu1 %v648_v11 }
  0x23   :  { %609 = vmatprep.mubr.bf16.mxu0 %v649_v12  ;;  %617 = vmatprep.mubr.bf16.mxu1 %v651_v13 }
  0x2a   :  { %610 = vmatmul.mubr.bf16.gmra.mxu0 %v650_v14  ;;  %618 = vmatmul.mubr.bf16.gmra.mxu1 %v652_v15 }
  0xe2   :  { %v607_v19 = vpop.f32.mrf.mxu0  ;;  %v615_v20 = vpop.f32.mrf.mxu1 }
  0xe3   :  { %v341_v21 = vadd.f32 %v607_v19, %v572_v18  ;;  %v349_v22 = vadd.f32 %v615_v20, %v572_v18 }
  0xe4   :  { %v218_v23 = vpop.f32.mrf.mxu0  ;;  %v250_v24 = vpop.f32.mrf.mxu1 }
  0xe5   :  { %v339_v25 = vadd.f32 %v572_v18, %v218_v23  ;;  %v368_v26 = vsel %vm357_vm0, %v349_v22, -1e+30  ;;  %v360_v27 = vsel %vm357_vm0, %v341_v21, -1e+30  ;;  %v347_v33 = vadd.f32 %v572_v18, %v250_v24 }
  0xe6   :  { %394 = vmax.xlane.f32.xlu0 %v368_v26  ;;  %v616_v28 = vpop.f32.mrf.mxu1  ;;  %378 = vmax.xlane.f32.xlu1 %v360_v27  ;;  %v608_v29 = vpop.f32.mrf.mxu0 }
  0xe7   :  { %v342_v30 = vadd.f32 %v608_v29, %v572_v18  ;;  %v350_v34 = vadd.f32 %v616_v28, %v572_v18  ;;  %v358_v35 = vsel %vm357_vm0, %v339_v25, -1e+30  ;;  %v366_v42 = vsel %vm357_vm0, %v347_v33, -1e+30 }
  0xe8   :  { %v221_v31 = vpop.f32.mrf.mxu0  ;;  %v253_v32 = vpop.f32.mrf.mxu1 }
  0xe9   :  { %v361_v36 = vsel %vm357_vm0, %v342_v30, -1e+30  ;;  %v340_v40 = vadd.f32 %v572_v18, %v221_v31  ;;  %v348_v41 = vadd.f32 %v572_v18, %v253_v32  ;;  %v369_v43 = vsel %vm357_vm0, %v350_v34, -1e+30 }
  0xea   :  { %374 = vmax.xlane.f32.xlu0 %v358_v35  ;;  %380 = vmax.xlane.f32.xlu1 %v361_v36  ;;  %v611_v37 = vpop.f32.mrf.mxu0  ;;  %v619_v38 = vpop.f32.mrf.mxu1 }
  0xeb   :  { %v345_v46 = vadd.f32 %v611_v37, %v572_v18  ;;  %v367_v48 = vsel %vm357_vm0, %v348_v41, -1e+30  ;;  %v359_v49 = vsel %vm357_vm0, %v340_v40, -1e+30  ;;  %v353_v61 = vadd.f32 %v619_v38, %v572_v18 }
  0xec   :  { %v234_v39 = vpop.f32.mrf.mxu0  ;;  %v266_v45 = vpop.f32.mrf.mxu1 }
  0xed   :  { %v364_v52 = vsel %vm357_vm0, %v345_v46, -1e+30  ;;  %v343_v54 = vadd.f32 %v572_v18, %v234_v39  ;;  %v351_v57 = vadd.f32 %v572_v18, %v266_v45  ;;  %v824_v1 = vsel %vm357_vm0, %v353_v61, -1e+30 }
  0xee   :  { %390 = vmax.xlane.f32.xlu0 %v366_v42  ;;  %396 = vmax.xlane.f32.xlu1 %v369_v43  ;;  %v612_v44 = vpop.f32.mrf.mxu0  ;;  %v620_v51 = vpop.f32.mrf.mxu1 }
  0xef   :  { %v346_v47 = vadd.f32 %v612_v44, %v572_v18  ;;  %v362_v59 = vsel %vm357_vm0, %v343_v54, -1e+30  ;;  %v354_v62 = vadd.f32 %v620_v51, %v572_v18  ;;  %v370_v63 = vsel %vm357_vm0, %v351_v57, -1e+30 }
  0xf0   :  { %v237_v50 = vpop.f32.mrf.mxu0  ;;  %v269_v56 = vpop.f32.mrf.mxu1 }
  0xf1   :  { %v365_v53 = vsel %vm357_vm0, %v346_v47, -1e+30  ;;  %v344_v55 = vadd.f32 %v572_v18, %v237_v50  ;;  %v352_v58 = vadd.f32 %v572_v18, %v269_v56  ;;  %v828_v2 = vsel %vm357_vm0, %v354_v62, -1e+30 }
  0xf2   :  { %392 = vmax.xlane.f32.xlu1 %v367_v48  ;;  %376 = vmax.xlane.f32.xlu0 %v359_v49 }
  0xf3   :  { %v363_v60 = vsel %vm357_vm0, %v344_v55, -1e+30  ;;  %v819_v0 = vsel %vm357_vm0, %v352_v58, -1e+30 }
  0xf6   :  { %386 = vmax.xlane.f32.xlu0 %v364_v52  ;;  %388 = vmax.xlane.f32.xlu1 %v365_v53 }
  0xfa   :  { %382 = vmax.xlane.f32.xlu0 %v362_v59  ;;  %384 = vmax.xlane.f32.xlu1 %v363_v60 }
  0xfe   :  { %398 = vmax.xlane.f32.xlu0 %v370_v63  ;;  %400 = vmax.xlane.f32.xlu1 %v819_v0 }
 0x102   :  { %402 = vmax.xlane.f32.xlu0 %v824_v1  ;;  %404 = vmax.xlane.f32.xlu1 %v828_v2 }
 0x16f   :  { %v395_v3 = vpop.xlane.xlu0 %394  ;;  %v379_v4 = vpop.xlane.xlu1 %378 }
 0x170   :  { %v832_v5 = vsub.f32 %v368_v26, %v395_v3  ;;  %v834_v6 = vsub.f32 %v360_v27, %v379_v4 }
 0x172   :  { %v426_v7 = vmul.f32 1.442695, %v834_v6  ;;  %v442_v10 = vmul.f32 1.442695, %v832_v5 }
 0x173   :  { %v375_v8 = vpop.xlane.xlu0 %374  ;;  %v381_v9 = vpop.xlane.xlu1 %380 }
 0x174   :  { %v838_v11 = vsub.f32 %v358_v35, %v375_v8  ;;  %v840_v12 = vsub.f32 %v361_v36, %v381_v9  ;;  %653 = vpow2.f32 %v426_v7 }
 0x175   :  { %655 = vpow2.f32 %v442_v10 }
 0x176   :  { %v428_v13 = vmul.f32 1.442695, %v840_v12  ;;  %v422_v16 = vmul.f32 1.442695, %v838_v11 }
 0x177   :  { %v391_v14 = vpop.xlane.xlu0 %390  ;;  %v397_v15 = vpop.xlane.xlu1 %396 }
 0x178   :  { %v844_v17 = vsub.f32 %v366_v42, %v391_v14  ;;  %v846_v18 = vsub.f32 %v369_v43, %v397_v15  ;;  %657 = vpow2.f32 %v428_v13 }
 0x179   :  { %659 = vpow2.f32 %v422_v16 }
 0x17a   :  { %v444_v19 = vmul.f32 1.442695, %v846_v18  ;;  %v438_v22 = vmul.f32 1.442695, %v844_v17 }
 0x17b   :  { %v393_v20 = vpop.xlane.xlu1 %392  ;;  %v377_v21 = vpop.xlane.xlu0 %376 }
 0x17c   :  { %v850_v23 = vsub.f32 %v359_v49, %v377_v21  ;;  %661 = vpow2.f32 %v444_v19  ;;  %v852_v24 = vsub.f32 %v367_v48, %v393_v20 }
 0x17d   :  { %663 = vpow2.f32 %v438_v22 }
 0x17e   :  { %v424_v25 = vmul.f32 1.442695, %v850_v23  ;;  %v440_v29 = vmul.f32 1.442695, %v852_v24 }
 0x17f   :  { %v387_v26 = vpop.xlane.xlu0 %386  ;;  %v389_v27 = vpop.xlane.xlu1 %388 }
 0x180   :  { %v855_v28 = vsub.f32 %v364_v52, %v387_v26  ;;  %665 = vpow2.f32 %v424_v25  ;;  %v858_v30 = vsub.f32 %v365_v53, %v389_v27 }
 0x181   :  { %v654_v31 = vpop.eup %653 }
 0x182   :  { %v434_v32 = vmul.f32 1.442695, %v855_v28  ;;  %458 = vadd.xlane.f32.xlu0 %v654_v31  ;;  %v656_v36 = vpop.eup %655  ;;  %v436_v37 = vmul.f32 1.442695, %v858_v30 }
 0x183   :  { %v383_v33 = vpop.xlane.xlu0 %382  ;;  %v385_v34 = vpop.xlane.xlu1 %384 }
 0x184   :  { %667 = vpow2.f32 %v434_v32  ;;  %v861_v35 = vsub.f32 %v362_v59, %v383_v33  ;;  %v864_v38 = vsub.f32 %v363_v60, %v385_v34 }
 0x185   :  { %669 = vpow2.f32 %v440_v29  ;;  %v658_v39 = vpop.eup %657 }
 0x186   :  { %v430_v40 = vmul.f32 1.442695, %v861_v35  ;;  %474 = vadd.xlane.f32.xlu0 %v656_v36  ;;  %460 = vadd.xlane.f32.xlu1 %v658_v39  ;;  %v660_v44 = vpop.eup %659  ;;  %v432_v45 = vmul.f32 1.442695, %v864_v38 }
 0x187   :  { %v399_v41 = vpop.xlane.xlu0 %398  ;;  %v401_v42 = vpop.xlane.xlu1 %400 }
 0x188   :  { %671 = vpow2.f32 %v430_v40  ;;  %v867_v43 = vsub.f32 %v370_v63, %v399_v41  ;;  %v871_v46 = vsub.f32 %v819_v0, %v401_v42 }
 0x189   :  { %673 = vpow2.f32 %v436_v37  ;;  %v662_v47 = vpop.eup %661 }
 0x18a   :  { %v446_v48 = vmul.f32 1.442695, %v867_v43  ;;  %454 = vadd.xlane.f32.xlu0 %v660_v44  ;;  %476 = vadd.xlane.f32.xlu1 %v662_v47  ;;  %v664_v52 = vpop.eup %663  ;;  %v448_v53 = vmul.f32 1.442695, %v871_v46 }
 0x18b   :  { %v403_v49 = vpop.xlane.xlu0 %402  ;;  %v405_v50 = vpop.xlane.xlu1 %404 }
 0x18c   :  { %675 = vpow2.f32 %v446_v48  ;;  %v875_v51 = vsub.f32 %v824_v1, %v403_v49  ;;  %v879_v54 = vsub.f32 %v828_v2, %v405_v50 }
 0x18d   :  { %677 = vpow2.f32 %v432_v45  ;;  %v666_v55 = vpop.eup %665 }
 0x18e   :  { %v450_v56 = vmul.f32 1.442695, %v875_v51  ;;  %470 = vadd.xlane.f32.xlu0 %v664_v52  ;;  %456 = vadd.xlane.f32.xlu1 %v666_v55  ;;  %v452_v58 = vmul.f32 1.442695, %v879_v54 }
 0x190   :  { %679 = vpow2.f32 %v450_v56 }
 0x191   :  { %v668_v57 = vpop.eup %667  ;;  %681 = vpow2.f32 %v448_v53 }
 0x192   :  { %v670_v59 = vpop.eup %669  ;;  %466 = vadd.xlane.f32.xlu0 %v668_v57  ;;  %683 = vpow2.f32 %v452_v58 }
 0x193   :  { %472 = vadd.xlane.f32.xlu1 %v670_v59 }
 0x195   :  { %v672_v60 = vpop.eup %671 }
 0x196   :  { %v674_v61 = vpop.eup %673  ;;  %462 = vadd.xlane.f32.xlu0 %v672_v60 }
 0x197   :  { %468 = vadd.xlane.f32.xlu1 %v674_v61 }
 0x199   :  { %v676_v62 = vpop.eup %675 }
 0x19a   :  { %v678_v63 = vpop.eup %677  ;;  %478 = vadd.xlane.f32.xlu0 %v676_v62 }
 0x19b   :  { %464 = vadd.xlane.f32.xlu1 %v678_v63 }
 0x19d   :  { %v680_v0 = vpop.eup %679 }
 0x19e   :  { %v682_v1 = vpop.eup %681  ;;  %482 = vadd.xlane.f32.xlu0 %v680_v0 }
 0x19f   :  { %480 = vadd.xlane.f32.xlu1 %v682_v1  ;;  %v684_v2 = vpop.eup %683 }
 0x1a3   :  { %484 = vadd.xlane.f32.xlu1 %v684_v2 }
 0x20b   :  { %v459_v3 = vpop.xlane.xlu0 %458 }
 0x20c   :  { %685 = vlog2.f32 %v459_v3 }
 0x20f   :  { %v475_v4 = vpop.xlane.xlu0 %474  ;;  %v461_v7 = vpop.xlane.xlu1 %460 }
 0x210   :  { %687 = vlog2.f32 %v475_v4 }
 0x211   :  { %689 = vlog2.f32 %v461_v7 }
 0x213   :  { %v455_v8 = vpop.xlane.xlu0 %454  ;;  %v477_v9 = vpop.xlane.xlu1 %476 }
 0x214   :  { %691 = vlog2.f32 %v455_v8 }
 0x215   :  { %693 = vlog2.f32 %v477_v9 }
 0x217   :  { %v471_v10 = vpop.xlane.xlu0 %470  ;;  %v457_v13 = vpop.xlane.xlu1 %456 }
 0x218   :  { %695 = vlog2.f32 %v471_v10 }
 0x219   :  { %v686_v14 = vpop.eup %685  ;;  %697 = vlog2.f32 %v457_v13 }
 0x21a   :  { %v491_v15 = vmul.f32 0.6931472, %v686_v14 }
 0x21b   :  { %v467_v16 = vpop.xlane.xlu0 %466 }
 0x21c   :  { %v473_v19 = vpop.xlane.xlu1 %472  ;;  %v520_v20 = vsub.f32 %v834_v6, %v491_v15  ;;  %699 = vlog2.f32 %v467_v16 }
 0x21d   :  { %v688_v21 = vpop.eup %687  ;;  %701 = vlog2.f32 %v473_v19 }
 0x21e   :  { %v690_v22 = vpop.eup %689  ;;  %536 = vst [vmem:[%s950_s3 + $0x10] sm:$0xff] %v520_v20  ;;  %v507_v25 = vmul.f32 0.6931472, %v688_v21 }
 0x21f   :  { %v493_v26 = vmul.f32 0.6931472, %v690_v22  ;;  %v463_v27 = vpop.xlane.xlu0 %462 }
 0x220   :  { %v469_v29 = vpop.xlane.xlu1 %468  ;;  %v528_v31 = vsub.f32 %v832_v5, %v507_v25  ;;  %703 = vlog2.f32 %v463_v27 }
 0x221   :  { %v692_v32 = vpop.eup %691  ;;  %v521_v33 = vsub.f32 %v840_v12, %v493_v26  ;;  %705 = vlog2.f32 %v469_v29 }
 0x222   :  { %v694_v6 = vpop.eup %693  ;;  %544 = vst [vmem:[%s950_s3 + $0x50] sm:$0xff] %v528_v31  ;;  %v487_v34 = vmul.f32 0.6931472, %v692_v32 }
 0x223   :  { %537 = vst [vmem:[%s950_s3 + $0x18] sm:$0xff] %v521_v33  ;;  %v509_v36 = vmul.f32 0.6931472, %v694_v6  ;;  %v479_v37 = vpop.xlane.xlu0 %478 }
 0x224   :  { %v465_v39 = vpop.xlane.xlu1 %464  ;;  %v518_v5 = vsub.f32 %v838_v11, %v487_v34  ;;  %707 = vlog2.f32 %v479_v37 }
 0x225   :  { %v696_v40 = vpop.eup %695  ;;  %v529_v12 = vsub.f32 %v846_v18, %v509_v36  ;;  %709 = vlog2.f32 %v465_v39 }
 0x226   :  { %v698_v41 = vpop.eup %697  ;;  %534 = vst [vmem:[%s950_s3] sm:$0xff] %v518_v5  ;;  %v503_v42 = vmul.f32 0.6931472, %v696_v40 }
 0x227   :  { %545 = vst [vmem:[%s950_s3 + $0x58] sm:$0xff] %v529_v12  ;;  %v489_v44 = vmul.f32 0.6931472, %v698_v41  ;;  %v483_v45 = vpop.xlane.xlu0 %482 }
 0x228   :  { %v481_v47 = vpop.xlane.xlu1 %480  ;;  %v526_v11 = vsub.f32 %v844_v17, %v503_v42  ;;  %711 = vlog2.f32 %v483_v45 }
 0x229   :  { %v700_v48 = vpop.eup %699  ;;  %v519_v18 = vsub.f32 %v850_v23, %v489_v44  ;;  %713 = vlog2.f32 %v481_v47 }
 0x22a   :  { %v702_v49 = vpop.eup %701  ;;  %542 = vst [vmem:[%s950_s3 + $0x40] sm:$0xff] %v526_v11  ;;  %v499_v50 = vmul.f32 0.6931472, %v700_v48 }
 0x22b   :  { %535 = vst [vmem:[%s950_s3 + $0x8] sm:$0xff] %v519_v18  ;;  %v505_v52 = vmul.f32 0.6931472, %v702_v49 }
 0x22c   :  { %v485_v53 = vpop.xlane.xlu1 %484  ;;  %v524_v55 = vsub.f32 %v855_v28, %v499_v50 }
 0x22d   :  { %715 = vlog2.f32 %v485_v53  ;;  %v704_v17 = vpop.eup %703  ;;  %v527_v56 = vsub.f32 %v852_v24, %v505_v52 }
 0x22e   :  { %v706_v23 = vpop.eup %705  ;;  %540 = vst [vmem:[%s950_s3 + $0x30] sm:$0xff] %v524_v55  ;;  %v495_v57 = vmul.f32 0.6931472, %v704_v17 }
 0x22f   :  { %543 = vst [vmem:[%s950_s3 + $0x48] sm:$0xff] %v527_v56  ;;  %v501_v58 = vmul.f32 0.6931472, %v706_v23 }
 0x230   :  { %v522_v59 = vsub.f32 %v861_v35, %v495_v57 }
 0x231   :  { %v708_v60 = vpop.eup %707  ;;  %v525_v28 = vsub.f32 %v858_v30, %v501_v58 }
 0x232   :  { %v710_v61 = vpop.eup %709  ;;  %538 = vst [vmem:[%s950_s3 + $0x20] sm:$0xff] %v522_v59  ;;  %v511_v24 = vmul.f32 0.6931472, %v708_v60 }
 0x233   :  { %541 = vst [vmem:[%s950_s3 + $0x38] sm:$0xff] %v525_v28  ;;  %v497_v62 = vmul.f32 0.6931472, %v710_v61 }
 0x234   :  { %v530_v63 = vsub.f32 %v867_v43, %v511_v24 }
 0x235   :  { %v712_v0 = vpop.eup %711  ;;  %v523_v1 = vsub.f32 %v864_v38, %v497_v62 }
 0x236   :  { %v714_v35 = vpop.eup %713  ;;  %546 = vst [vmem:[%s950_s3 + $0x60] sm:$0xff] %v530_v63  ;;  %v515_v30 = vmul.f32 0.6931472, %v712_v0 }
 0x237   :  { %539 = vst [vmem:[%s950_s3 + $0x28] sm:$0xff] %v523_v1  ;;  %v513_v2 = vmul.f32 0.6931472, %v714_v35 }
 0x238   :  { %v532_v3 = vsub.f32 %v875_v51, %v515_v30 }
 0x239   :  { %v531_v7 = vsub.f32 %v871_v46, %v513_v2 }
 0x23a   :  { %v716_v4 = vpop.eup %715  ;;  %548 = vst [vmem:[%s950_s3 + $0x70] sm:$0xff] %v532_v3 }
 0x23b   :  { %v517_v38 = vmul.f32 0.6931472, %v716_v4  ;;  %547 = vst [vmem:[%s950_s3 + $0x68] sm:$0xff] %v531_v7 }
 0x23d   :  { %v533_v43 = vsub.f32 %v879_v54, %v517_v38 }
 0x23f   :  { %549 = vst [vmem:[%s950_s3 + $0x78] sm:$0xff] %v533_v43 }

</bundles_post_ra>
